<compile_context>
chip_gen: v5e
topology: v5e:2x2
jax: 0.10.0
libtpu: 0.0.40
codegen_flags: <defaults>
</compile_context>

<pallas_src>
import functools

import jax
import jax.numpy as jnp
from jax import lax
from jax.experimental import pallas as pl
from jax.experimental.pallas import tpu as pltpu


def _round_up(x, m):
    return ((x + m - 1) // m) * m


def _vmem_capacity_bytes():
    """Per-core VMEM capacity; conservative fallback (v7x = 64 MiB) if unknown."""
    try:
        return int(pltpu.get_tpu_info().vmem_capacity_bytes)
    except Exception:
        return 64 * 1024 * 1024


def _choose_vc(v, max_vc=2048):
    """Vocab chunk (lane) width: full vocab if small, else a multiple of 128."""
    if v <= max_vc:
        return v
    return max_vc


def _choose_tm(vc, dtype, n_rows, budget_bytes):
    """Largest multiple-of-8 row tile whose per-step VMEM footprint fits."""
    in_bytes = jnp.dtype(dtype).itemsize
    # per row: double-buffered input chunk + ~4 f32 elementwise temps over the
    # chunk + (tiny) labels / accumulators, padded a little.
    per_row = vc * (2 * in_bytes + 4 * 4) + 64
    tm = (budget_bytes // per_row) // 8 * 8
    tm = int(max(8, min(1024, tm)))
    return min(tm, _round_up(max(n_rows, 1), 8))


def _ce_tile_kernel(logits_ref, labels_ref, out_ref, m_sc, s_sc, p_sc,
                    *, pad_id, n_rows, tm, vc, v_total):
    """Grid step (b, t, c): online logsumexp over vocab chunk c of row tile t."""
    t = pl.program_id(1)
    c = pl.program_id(2)
    nc = pl.num_programs(2)

    @pl.when(c == 0)
    def _():
        m_sc[...] = jnp.full((tm, 1), -jnp.inf, jnp.float32)
        s_sc[...] = jnp.zeros((tm, 1), jnp.float32)
        p_sc[...] = jnp.zeros((tm, 1), jnp.float32)

    lbl = labels_ref[0]                 # (tm, 1) int32, resident across chunks
    xc = logits_ref[0]                  # (tm, vc) native dtype (bf16 / f32)

    # Global vocab index of each lane of this chunk: (1, vc) iota, broadcast in
    # the compares below (no tm x vc int32 temp).
    lane = c * vc + lax.broadcasted_iota(jnp.int32, (1, vc), 1)
    if v_total % vc != 0:
        # Last chunk overhangs the vocab axis: neutralize garbage lanes.
        xc = jnp.where(lane < v_total, xc, -jnp.inf)

    # Online (streaming) logsumexp; max / gather on the native dtype, f32 only
    # inside the exp/accumulators.
    m_prev = m_sc[...]
    m_new = jnp.maximum(m_prev,
                        jnp.max(xc, axis=-1, keepdims=True).astype(jnp.float32))
    e_sum = jnp.sum(jnp.exp(xc.astype(jnp.float32) - m_new),
                    axis=-1, keepdims=True)
    s_sc[...] = s_sc[...] * jnp.exp(m_prev - m_new) + e_sum
    m_sc[...] = m_new
    p_sc[...] = p_sc[...] + jnp.sum(jnp.where(lane == lbl, xc, 0),
                                    axis=-1, keepdims=True).astype(jnp.float32)

    @pl.when(c == nc - 1)
    def _():
        # Rows past the true shifted length (S-1) are edge-block garbage: mask.
        row = t * tm + lax.broadcasted_iota(jnp.int32, (tm, 1), 0)
        valid = jnp.logical_and(lbl != pad_id, row < n_rows)
        per_row = m_sc[...] + jnp.log(s_sc[...]) - p_sc[...]   # lse - picked
        per_row = jnp.where(valid, per_row, 0.0)
        vsum = jnp.sum(per_row)
        vcnt = jnp.sum(valid.astype(jnp.float32))
        # Pack sum (sublane 0) and count (sublane 1) into one lane-dense block.
        sub = lax.broadcasted_iota(jnp.int32, (8, 128), 0)
        out_ref[0, 0] = jnp.where(sub == 0, vsum,
                                  jnp.where(sub == 1, vcnt, 0.0))


def loss_pipeline_layer(logits, labels, pad_id, *, tm=None, vc=None):
    """Pallas equivalent of LossPipelineLayer.forward((logits, labels))."""
    assert logits.ndim == 3 and labels.ndim == 2
    B, S, V = logits.shape
    n_rows = S - 1                       # shifted (next-token) positions per row
    if n_rows <= 0:
        return jnp.float32(jnp.nan)      # matches torch: empty target -> nan

    # Vocab chunk width (lane dim): full vocab if small, else multiple of 128.
    if vc is None:
        vc = _choose_vc(V)
    vc = int(vc)
    if vc >= V:
        vc = V
    else:
        vc = max(128, (vc // 128) * 128)
    C = -(-V // vc)

    # Generation-aware VMEM budget (conservative on v7x's 64 MiB VMEM).
    cap = _vmem_capacity_bytes()
    vmem_limit = int(min(max(cap - 20 * 1024 * 1024, cap // 2),
                         100 * 1024 * 1024))
    budget = (vmem_limit * 3) // 4

    if tm is None:
        tm = _choose_tm(vc, logits.dtype, n_rows, budget)
    tm = max(8, (int(tm) // 8) * 8)
    if S >= 8:
        tm = min(tm, (S // 8) * 8)       # keep the row tile inside the seq axis
    T = -(-n_rows // tm)

    # Tiny-sequence edge case only (S < 8): pad the seq axis so the block fits.
    if tm > S:
        logits = jnp.concatenate(
            [logits, jnp.zeros((B, tm - S, V), logits.dtype)], axis=1)

    # Shift only the small labels array; pad its tile dim with pad_id (ignored).
    shift_labels = labels[:, 1:].astype(jnp.int32)
    n_rows_pad = T * tm
    if n_rows_pad > n_rows:
        shift_labels = jnp.concatenate(
            [shift_labels,
             jnp.full((B, n_rows_pad - n_rows), pad_id, jnp.int32)], axis=1)
    shift_labels = shift_labels.reshape(B, n_rows_pad, 1)

    kernel = functools.partial(_ce_tile_kernel, pad_id=int(pad_id),
                               n_rows=n_rows, tm=tm, vc=vc, v_total=V)

    itemsize = jnp.dtype(logits.dtype).itemsize
    cost = pl.CostEstimate(
        flops=6 * B * n_rows * V,
        transcendentals=B * n_rows * V,
        bytes_accessed=B * S * V * itemsize + B * S * 4 + B * T * 8 * 128 * 4,
    )

    out = pl.pallas_call(
        kernel,
        out_shape=jax.ShapeDtypeStruct((B, T, 8, 128), jnp.float32),
        grid=(B, T, C),
        in_specs=[
            pl.BlockSpec((1, tm, vc), lambda b, t, c: (b, t, c)),
            pl.BlockSpec((1, tm, 1), lambda b, t, c: (b, t, 0)),
        ],
        out_specs=pl.BlockSpec((1, 1, 8, 128), lambda b, t, c: (b, t, 0, 0)),
        scratch_shapes=[
            pltpu.VMEM((tm, 1), jnp.float32),   # running max
            pltpu.VMEM((tm, 1), jnp.float32),   # running sum-exp
            pltpu.VMEM((tm, 1), jnp.float32),   # picked logit
        ],
        compiler_params=pltpu.CompilerParams(
            dimension_semantics=("parallel", "parallel", "arbitrary"),
            vmem_limit_bytes=vmem_limit,
        ),
        cost_estimate=cost,
    )(logits, shift_labels)

    loss_sum = jnp.sum(out[:, :, 0, 0])
    valid_cnt = jnp.sum(out[:, :, 1, 0])
    # CrossEntropyLoss(reduction='mean', ignore_index=pad_id); like torch this
    # yields NaN when every shifted label equals pad_id.
    return (loss_sum / valid_cnt).astype(jnp.float32)


def _reference_loss(logits, labels, pad_id):
    B, S, V = logits.shape
    sl = logits[:, :-1, :].reshape(-1, V).astype(jnp.float32)
    tl = labels[:, 1:].reshape(-1)
    lse = jax.nn.logsumexp(sl, axis=-1)
    picked = jnp.take_along_axis(sl, tl[:, None], axis=-1)[:, 0]
    valid = tl != pad_id
    per = jnp.where(valid, lse - picked, 0.0)
    return jnp.sum(per) / jnp.sum(valid.astype(jnp.float32))


def _check(loss, ref, tol, name):
    assert jnp.isfinite(loss), f"{name}: loss not finite"
    assert abs(float(loss) - float(ref)) < tol, (name, float(loss), float(ref))


if __name__ == "__main__":
    key = jax.random.PRNGKey(0)
    ks = jax.random.split(key, 8)
    pad_id = 0

    # case 1: single row tile, single vocab chunk
    B, S, V = 2, 8, 128
    logits = jax.random.normal(ks[0], (B, S, V), dtype=jnp.float32)
    labels = jax.random.randint(ks[1], (B, S), 0, V, dtype=jnp.int32)
    labels = labels.at[0, 3].set(pad_id).at[1, 6].set(pad_id)
    loss = jax.block_until_ready(loss_pipeline_layer(logits, labels, pad_id))
    ref = jax.block_until_ready(_reference_loss(logits, labels, pad_id))
    _check(loss, ref, 1e-4, "case1")

    # case 2: multiple row tiles with a masked partial last row (forced tm)
    B, S, V = 2, 24, 256
    logits2 = jax.random.normal(ks[2], (B, S, V), dtype=jnp.float32)
    labels2 = jax.random.randint(ks[3], (B, S), 0, V, dtype=jnp.int32)
    labels2 = labels2.at[0, 5].set(pad_id).at[1, 20].set(pad_id)
    loss2 = jax.block_until_ready(
        loss_pipeline_layer(logits2, labels2, pad_id, tm=8))
    ref2 = jax.block_until_ready(_reference_loss(logits2, labels2, pad_id))
    _check(loss2, ref2, 1e-4, "case2")

    # case 3: multiple vocab chunks with a masked (overhanging) tail chunk
    B, S, V = 2, 16, 640
    logits3 = jax.random.normal(ks[4], (B, S, V), dtype=jnp.float32)
    labels3 = jax.random.randint(ks[5], (B, S), 0, V, dtype=jnp.int32)
    labels3 = labels3.at[0, 2].set(pad_id).at[1, 11].set(pad_id)
    loss3 = jax.block_until_ready(
        loss_pipeline_layer(logits3, labels3, pad_id, tm=8, vc=256))
    ref3 = jax.block_until_ready(_reference_loss(logits3, labels3, pad_id))
    _check(loss3, ref3, 1e-4, "case3")

    # case 4: bf16 logits (native-dtype max/gather path)
    B, S, V = 2, 16, 512
    logits4 = jax.random.normal(ks[6], (B, S, V),
                                dtype=jnp.float32).astype(jnp.bfloat16)
    labels4 = jax.random.randint(ks[7], (B, S), 0, V, dtype=jnp.int32)
    labels4 = labels4.at[0, 7].set(pad_id).at[1, 1].set(pad_id)
    loss4 = jax.block_until_ready(
        loss_pipeline_layer(logits4, labels4, pad_id, vc=256))
    ref4 = jax.block_until_ready(_reference_loss(logits4, labels4, pad_id))
    _check(loss4, ref4, 5e-3, "case4")

    print("KERNEL_OK")
</pallas_src>

<mosaic_0001>
module attributes {stable_mosaic.version = 11 : i64} {
  func.func @_ce_tile_kernel(%arg0: i32, %arg1: i32, %arg2: i32, %arg3: memref<1x8x128xf32, #tpu.memory_space<vmem>>, %arg4: memref<1x8x1xi32, #tpu.memory_space<vmem>>, %arg5: memref<1x1x8x128xf32, #tpu.memory_space<vmem>>, %arg6: memref<8x1xf32, #tpu.memory_space<vmem>>, %arg7: memref<8x1xf32, #tpu.memory_space<vmem>>, %arg8: memref<8x1xf32, #tpu.memory_space<vmem>>) attributes {dimension_semantics = [#tpu.dimension_semantics<parallel>, #tpu.dimension_semantics<parallel>, #tpu.dimension_semantics<arbitrary>], iteration_bounds = array<i64: 2, 1, 1>, scalar_prefetch = 0 : i64, scratch_operands = 3 : i64, tpu.core_type = #tpu.core_type<tc>, window_params = [{transform_indices = @transform_0, window_bounds = array<i64: 1, 8, 128>}, {transform_indices = @transform_1, window_bounds = array<i64: 1, 8, 1>}, {transform_indices = @transform_2, window_bounds = array<i64: 1, 1, 8, 128>}]} {
    %c0_i32 = arith.constant 0 : i32
    %0 = arith.cmpi eq, %arg2, %c0_i32 : i32
    %1 = arith.extui %0 : i1 to i32
    %c0_i32_0 = arith.constant 0 : i32
    %2 = arith.cmpi ne, %1, %c0_i32_0 : i32
    scf.if %2 {
      %cst_23 = arith.constant 0xFF800000 : f32
      %41 = vector.broadcast %cst_23 : f32 to vector<8x1xf32>
      %c0_24 = arith.constant 0 : index
      %c0_25 = arith.constant 0 : index
      %42 = vector.load %arg6[%c0_24, %c0_25] : memref<8x1xf32, #tpu.memory_space<vmem>>, vector<8x1xf32>
      tpu.vector_store %arg6[%c0_24, %c0_25], %41 {strides = array<i32>} : memref<8x1xf32, #tpu.memory_space<vmem>>, vector<8x1xf32>,
      %cst_26 = arith.constant 0.000000e+00 : f32
      %43 = vector.broadcast %cst_26 : f32 to vector<8x1xf32>
      %c0_27 = arith.constant 0 : index
      %c0_28 = arith.constant 0 : index
      %44 = vector.load %arg7[%c0_27, %c0_28] : memref<8x1xf32, #tpu.memory_space<vmem>>, vector<8x1xf32>
      tpu.vector_store %arg7[%c0_27, %c0_28], %43 {strides = array<i32>} : memref<8x1xf32, #tpu.memory_space<vmem>>, vector<8x1xf32>,
      %cst_29 = arith.constant 0.000000e+00 : f32
      %45 = vector.broadcast %cst_29 : f32 to vector<8x1xf32>
      %c0_30 = arith.constant 0 : index
      %c0_31 = arith.constant 0 : index
      %46 = vector.load %arg8[%c0_30, %c0_31] : memref<8x1xf32, #tpu.memory_space<vmem>>, vector<8x1xf32>
      tpu.vector_store %arg8[%c0_30, %c0_31], %45 {strides = array<i32>} : memref<8x1xf32, #tpu.memory_space<vmem>>, vector<8x1xf32>,
    } else {
    }
    %c0 = arith.constant 0 : index
    %c0_1 = arith.constant 0 : index
    %c0_2 = arith.constant 0 : index
    %3 = vector.load %arg4[%c0, %c0_1, %c0_2] : memref<1x8x1xi32, #tpu.memory_space<vmem>>, vector<1x8x1xi32>
    %4 = vector.shape_cast %3 : vector<1x8x1xi32> to vector<8x1xi32>
    %c0_3 = arith.constant 0 : index
    %c0_4 = arith.constant 0 : index
    %c0_5 = arith.constant 0 : index
    %5 = vector.load %arg3[%c0_3, %c0_4, %c0_5] : memref<1x8x128xf32, #tpu.memory_space<vmem>>, vector<1x8x128xf32>
    %6 = vector.shape_cast %5 : vector<1x8x128xf32> to vector<8x128xf32>
    %c128_i32 = arith.constant 128 : i32
    %7 = arith.muli %arg2, %c128_i32 : i32
    %8 = tpu.iota {dimensions = array<i32: 1>} : vector<1x128xi32>
    %9 = vector.broadcast %7 : i32 to vector<1x128xi32>
    %10 = arith.addi %9, %8 : vector<1x128xi32>
    %c0_6 = arith.constant 0 : index
    %c0_7 = arith.constant 0 : index
    %11 = vector.load %arg6[%c0_6, %c0_7] : memref<8x1xf32, #tpu.memory_space<vmem>>, vector<8x1xf32>
    %cst = arith.constant dense<0xFF800000> : vector<8xf32>
    %12 = vector.multi_reduction <maximumf>, %6, %cst [1] : vector<8x128xf32> to vector<8xf32>
    %13 = vector.shape_cast %12 : vector<8xf32> to vector<8x1xf32>
    %14 = arith.maximumf %11, %13 : vector<8x1xf32>
    %15 = vector.broadcast %14 : vector<8x1xf32> to vector<8x128xf32>
    %16 = arith.subf %6, %15 : vector<8x128xf32>
    %17 = math.exp %16 : vector<8x128xf32>
    %cst_8 = arith.constant dense<0.000000e+00> : vector<8xf32>
    %18 = vector.multi_reduction <add>, %17, %cst_8 [1] : vector<8x128xf32> to vector<8xf32>
    %19 = vector.shape_cast %18 : vector<8xf32> to vector<8x1xf32>
    %c0_9 = arith.constant 0 : index
    %c0_10 = arith.constant 0 : index
    %20 = vector.load %arg7[%c0_9, %c0_10] : memref<8x1xf32, #tpu.memory_space<vmem>>, vector<8x1xf32>
    %21 = arith.subf %11, %14 : vector<8x1xf32>
    %22 = math.exp %21 : vector<8x1xf32>
    %23 = arith.mulf %20, %22 : vector<8x1xf32>
    %24 = arith.addf %23, %19 : vector<8x1xf32>
    %c0_11 = arith.constant 0 : index
    %c0_12 = arith.constant 0 : index
    %25 = vector.load %arg7[%c0_11, %c0_12] : memref<8x1xf32, #tpu.memory_space<vmem>>, vector<8x1xf32>
    tpu.vector_store %arg7[%c0_11, %c0_12], %24 {strides = array<i32>} : memref<8x1xf32, #tpu.memory_space<vmem>>, vector<8x1xf32>,
    %c0_13 = arith.constant 0 : index
    %c0_14 = arith.constant 0 : index
    %26 = vector.load %arg6[%c0_13, %c0_14] : memref<8x1xf32, #tpu.memory_space<vmem>>, vector<8x1xf32>
    tpu.vector_store %arg6[%c0_13, %c0_14], %14 {strides = array<i32>} : memref<8x1xf32, #tpu.memory_space<vmem>>, vector<8x1xf32>,
    %c0_15 = arith.constant 0 : index
    %c0_16 = arith.constant 0 : index
    %27 = vector.load %arg8[%c0_15, %c0_16] : memref<8x1xf32, #tpu.memory_space<vmem>>, vector<8x1xf32>
    %28 = vector.broadcast %10 : vector<1x128xi32> to vector<8x128xi32>
    %29 = vector.broadcast %4 : vector<8x1xi32> to vector<8x128xi32>
    %30 = arith.cmpi eq, %28, %29 : vector<8x128xi32>
    %c0_i32_17 = arith.constant 0 : i32
    %31 = arith.sitofp %c0_i32_17 : i32 to f32
    %32 = vector.broadcast %31 : f32 to vector<8x128xf32>
    %33 = arith.select %30, %6, %32 : vector<8x128xi1>, vector<8x128xf32>
    %cst_18 = arith.constant dense<0.000000e+00> : vector<8xf32>
    %34 = vector.multi_reduction <add>, %33, %cst_18 [1] : vector<8x128xf32> to vector<8xf32>
    %35 = vector.shape_cast %34 : vector<8xf32> to vector<8x1xf32>
    %36 = arith.addf %27, %35 : vector<8x1xf32>
    %c0_19 = arith.constant 0 : index
    %c0_20 = arith.constant 0 : index
    %37 = vector.load %arg8[%c0_19, %c0_20] : memref<8x1xf32, #tpu.memory_space<vmem>>, vector<8x1xf32>
    tpu.vector_store %arg8[%c0_19, %c0_20], %36 {strides = array<i32>} : memref<8x1xf32, #tpu.memory_space<vmem>>, vector<8x1xf32>,
    %c0_i32_21 = arith.constant 0 : i32
    %38 = arith.cmpi eq, %arg2, %c0_i32_21 : i32
    %39 = arith.extui %38 : i1 to i32
    %c0_i32_22 = arith.constant 0 : i32
    %40 = arith.cmpi ne, %39, %c0_i32_22 : i32
    scf.if %40 {
      %c8_i32 = arith.constant 8 : i32
      %41 = arith.muli %arg1, %c8_i32 : i32
      %42 = tpu.iota {dimensions = array<i32: 0>} : vector<8x1xi32>
      %43 = vector.broadcast %41 : i32 to vector<8x1xi32>
      %44 = arith.addi %43, %42 : vector<8x1xi32>
      %c0_i32_23 = arith.constant 0 : i32
      %45 = vector.broadcast %c0_i32_23 : i32 to vector<8x1xi32>
      %46 = arith.cmpi ne, %4, %45 : vector<8x1xi32>
      %c7_i32 = arith.constant 7 : i32
      %47 = vector.broadcast %c7_i32 : i32 to vector<8x1xi32>
      %48 = arith.cmpi slt, %44, %47 : vector<8x1xi32>
      %49 = arith.andi %46, %48 : vector<8x1xi1>
      %c0_24 = arith.constant 0 : index
      %c0_25 = arith.constant 0 : index
      %50 = vector.load %arg6[%c0_24, %c0_25] : memref<8x1xf32, #tpu.memory_space<vmem>>, vector<8x1xf32>
      %c0_26 = arith.constant 0 : index
      %c0_27 = arith.constant 0 : index
      %51 = vector.load %arg7[%c0_26, %c0_27] : memref<8x1xf32, #tpu.memory_space<vmem>>, vector<8x1xf32>
      %52 = math.log %51 : vector<8x1xf32>
      %53 = arith.addf %50, %52 : vector<8x1xf32>
      %c0_28 = arith.constant 0 : index
      %c0_29 = arith.constant 0 : index
      %54 = vector.load %arg8[%c0_28, %c0_29] : memref<8x1xf32, #tpu.memory_space<vmem>>, vector<8x1xf32>
      %55 = arith.subf %53, %54 : vector<8x1xf32>
      %cst_30 = arith.constant 0.000000e+00 : f32
      %56 = vector.broadcast %cst_30 : f32 to vector<8x1xf32>
      %57 = arith.select %49, %55, %56 : vector<8x1xi1>, vector<8x1xf32>
      %58 = vector.shape_cast %57 : vector<8x1xf32> to vector<1x8x1xf32>
      %cst_31 = arith.constant dense<0.000000e+00> : vector<1xf32>
      %59 = vector.multi_reduction <add>, %58, %cst_31 [1, 2] : vector<1x8x1xf32> to vector<1xf32>
      %60 = vector.shape_cast %59 : vector<1xf32> to vector<1x1x1xf32>
      %61 = vector.extract %60[0, 0, 0] : f32 from vector<1x1x1xf32>
      %62 = arith.extui %49 : vector<8x1xi1> to vector<8x1xi32>
      %63 = arith.sitofp %62 : vector<8x1xi32> to vector<8x1xf32>
      %64 = vector.shape_cast %63 : vector<8x1xf32> to vector<1x8x1xf32>
      %cst_32 = arith.constant dense<0.000000e+00> : vector<1xf32>
      %65 = vector.multi_reduction <add>, %64, %cst_32 [1, 2] : vector<1x8x1xf32> to vector<1xf32>
      %66 = vector.shape_cast %65 : vector<1xf32> to vector<1x1x1xf32>
      %67 = vector.extract %66[0, 0, 0] : f32 from vector<1x1x1xf32>
      %68 = tpu.iota {dimensions = array<i32: 0>} : vector<8x128xi32>
      %c0_i32_33 = arith.constant 0 : i32
      %69 = vector.broadcast %c0_i32_33 : i32 to vector<8x128xi32>
      %70 = arith.cmpi eq, %68, %69 : vector<8x128xi32>
      %c1_i32 = arith.constant 1 : i32
      %71 = vector.broadcast %c1_i32 : i32 to vector<8x128xi32>
      %72 = arith.cmpi eq, %68, %71 : vector<8x128xi32>
      %cst_34 = arith.constant 0.000000e+00 : f32
      %73 = vector.broadcast %67 : f32 to vector<8x128xf32>
      %74 = vector.broadcast %cst_34 : f32 to vector<8x128xf32>
      %75 = arith.select %72, %73, %74 : vector<8x128xi1>, vector<8x128xf32>
      %76 = vector.broadcast %61 : f32 to vector<8x128xf32>
      %77 = arith.select %70, %76, %75 : vector<8x128xi1>, vector<8x128xf32>
      %c0_35 = arith.constant 0 : index
      %c0_36 = arith.constant 0 : index
      %c0_37 = arith.constant 0 : index
      %c0_38 = arith.constant 0 : index
      %78 = vector.load %arg5[%c0_35, %c0_36, %c0_37, %c0_38] : memref<1x1x8x128xf32, #tpu.memory_space<vmem>>, vector<1x1x8x128xf32>
      %79 = vector.shape_cast %78 : vector<1x1x8x128xf32> to vector<8x128xf32>
      %80 = vector.shape_cast %77 : vector<8x128xf32> to vector<1x1x8x128xf32>
      tpu.vector_store %arg5[%c0_35, %c0_36, %c0_37, %c0_38], %80 {strides = array<i32>} : memref<1x1x8x128xf32, #tpu.memory_space<vmem>>, vector<1x1x8x128xf32>,
    } else {
    }
    return
  }
  func.func @transform_0(%arg0: i32, %arg1: i32, %arg2: i32) -> (i32, i32, i32) {
    %c0_i32 = arith.constant 0 : i32
    return %arg0, %arg1, %arg2 : i32, i32, i32
  }
  func.func @transform_1(%arg0: i32, %arg1: i32, %arg2: i32) -> (i32, i32, i32) {
    %c0_i32 = arith.constant 0 : i32
    %c0_i32_0 = arith.constant 0 : i32
    return %arg0, %arg1, %c0_i32 : i32, i32, i32
  }
  func.func @transform_2(%arg0: i32, %arg1: i32, %arg2: i32) -> (i32, i32, i32, i32) {
    %c0_i32 = arith.constant 0 : i32
    %c0_i32_0 = arith.constant 0 : i32
    %c0_i32_1 = arith.constant 0 : i32
    return %arg0, %arg1, %c0_i32, %c0_i32_0 : i32, i32, i32, i32
  }
}

</mosaic_0001>

<bundles_post_ra>
// kernel: tpu_custom_call.1
= control target key start
LH: loop header
LB: loop body
LE: loop exit
PB: predicated region body
PF: predicated region fallthrough
CT: control target
= control target key end

     0   :  { %7 = vsyncpa [#allocation6], 0  ;;  %s704_s0 = inlined_call_operand.vmem [shape: f32[2,8,128], index: 0, kind: input, shape index: {}]   ;;  %s705_s1 = inlined_call_operand.vmem [shape: s32[2,8,1], index: 1, kind: input, shape index: {}]   ;;  %s706_s2 = inlined_call_operand.hbm [shape: f32[2,1,8,128], index: 2, kind: output, shape index: {}]  }
   0x1   :  { %9 = vsyncpa [#allocation6 + $0x1], 0  ;;  %s596_s9 = smov 0   ;;  %s598_s10 = smov 0  }
   0x2   :  { %s600_s11 = smov 0   ;;  %s602_s12 = smov 0  }
   0x3   :  { %s604_s13 = smov 0   ;;  %s606_s14 = smov 0  }
   0x4 LB: > { %s415_s15 = sadd.s32 4294967295, %s576_s14   ;;  %s416_s16 = sadd.s32 4294967294, %s576_s14   ;;  %s576_s14 = sphi %s606_s14, %s15_s14   ;;  %s572_s13 = sphi %s604_s13, %s713_s13   ;;  %s568_s12 = sphi %s602_s12, %s712_s12   ;;  %s564_s11 = sphi %s600_s11, %s711_s11   ;;  %s560_s10 = sphi %s598_s10, %s710_s10   ;;  %s556_s9 = sphi %s596_s9, %s709_s9  }
   0x5   : > { %s34_s17 = sadd.s32 1, %s572_s13  ;;  %s101_s18 = sadd.s32 1, %s564_s11 }
   0x6   : > { %p36_p0 = scmp.ge.s32.totalorder %s34_s17, 2  ;;  %p111_p1 = scmp.ne.s32.totalorder %s564_s11, %s560_s10 }
   0x7   : > { %p112_p2 = scmp.eq.s32.totalorder %s415_s15, 1  ;;  %p117_p3 = scmp.ne.s32.totalorder %s560_s10, %s556_s9 }
   0x8   : > { %s715_s17 = smov (%p36_p0, %s34_s17), 0  ;;  %p118_p5 = scmp.eq.s32.totalorder %s416_s16, 1 }
   0x9   : > { %p636_p4 = por %p112_p2, %p111_p1  ;;  %s96_s20 = ssub.s32 %s572_s13, %s715_s17 }
   0xa   : > { %p419_p6 = scmp.ge.s32.totalorder %s576_s14, 1  ;;  %p99_p7 = scmp.eq.s32.totalorder %s96_s20, 0 }
   0xb   : > { %p643_p8 = por %p118_p5, %p117_p3  ;;  %p159_p9 = scmp.lt.s32.totalorder %s576_s14, 3 }
   0xc   : > { %s649_s22 = scalar_select %p99_p7, %s564_s11, %s101_s18  }
   0xd   : > { %p160_p10 = pnand %p419_p6, %p159_p9 }
   0xe   : > { %p193_p11 = scmp.lt.s32.totalorder (!%p160_p10), %s568_s12, 1  ;;  %s190_s3 = sand.u32 (!%p160_p10), 1, %s560_s10  }
   0xf   : > { %163 = sbr.rel (%p160_p10) target bundleno = 602 (0x25a), region = 28  ;;  %s420_s4 = sshll.u32 (!%p160_p10), %s190_s3, 3 }
  0x10   : > { %s425_s5 = sshll.u32 (!%p160_p10), %s568_s12, 3  ;;  %s192_s15 = scalar_lea.vmem (!%p160_p10), [#allocation5], %s420_s4 }
  0x11   : > { %s318_s8 = scalar_lea.hbm (!%p160_p10), %s706_s2, %s425_s5  ;;  %s320_s16 = sshll.u32 (!%p160_p10), %s192_s15, 4  ;;  %s321_s16 = int_to_ptr.vmem [resolvable:$true] %s320_s16 }
  0x12   : > { %s322_s20 = sshll.u32 (!%p160_p10), %s318_s8, 4  ;;  %s518_s28 = scalar_lea.hbm (!%p160_p10), %s706_s2, 16  ;;  %s323_s20 = int_to_ptr.hbm [resolvable:$true] %s322_s20 }
  0x14   : > { %vm214_vm0 = vcmask 7168   ;;  %v578_v0 = vmov -inf   ;;  %s194_s23 = scalar_select %p193_p11, %s568_s12, 1  ;;  %v579_v2 = vmov 0   ;;  %v580_v3 = vmov 0.0  }
  0x15   : > { %215 = vst.msk [vmem:[#allocation2] sm:$0xff] %vm214_vm0, %v578_v0  ;;  %490 = vset.pattern.permute.xlu0 %v579_v2  ;;  %491 = vset.pattern.permute.xlu1 %v579_v2  ;;  %v221_v9 = vlaneseq  ;;  %s307_s12 = scalar_lea.sflag [#allocation6], %s190_s3 }
  0x16   : > { %s421_s24 = sshll.u32 %s194_s23, 3  ;;  %216 = vst.msk [vmem:[#allocation3] sm:$0xff] %vm214_vm0, %v580_v3 }
  0x17   : > { %s202_s27 = scalar_lea.vmem %s704_s0, %s421_s24  ;;  %s209_s30 = scalar_lea.vmem %s705_s1, %s421_s24  ;;  %217 = vst.msk [vmem:[#allocation4] sm:$0xff] %vm214_vm0, %v580_v3  ;;  %v222_v11 = vand.u32 127, %v221_v9  ;;  %v263_v27 = vshrl.u32 %v221_v9, 7 }
  0x18   : > { %v219_v1 = vld [vmem:[%s202_s27] sm:$0xff]  ;;  %s512_s24 = sshra.s32 %s323_s20, 4  ;;  %s513_s24 = int_to_ptr.hbm [resolvable:$true] %s512_s24 }
  0x19   : > { %226 = vmax.xlane.f32.xlu0 %v219_v1  ;;  %v218_v4 = vld [vmem:[%s209_s30] sm:$0xff]  ;;  %vm267_vm3 = vcmp.lt.s32.totalorder %v263_v27, 7  ;;  %vm300_vm5 = vcmp.eq.s32.totalorder %v263_v27, 1  ;;  %vm299_vm6 = vcmp.eq.s32.totalorder %v263_v27, 0  ;;  %s514_s25 = scalar_lea.hbm %s513_s24, 8  ;;  %p519_p1 = scmp.lt.s32.totalorder %s513_s24, %s706_s2 }
  0x1a   : > { %250 = vperm.xlu1 %491, %v218_v4   ;;  %vm266_vm2 = vcmp.ne.s32.totalorder %v218_v4, 0  ;;  %p515_p12 = scmp.ne.s32.totalorder %s513_s24, %s514_s25  ;;  %p520_p2 = scmp.lt.s32.totalorder %s518_s28, %s514_s25 }
  0x1b   : > { %vm268_vm4 = vmand %vm266_vm2, %vm267_vm3 }
  0x1c   : > { %v225_v5 = vld [vmem:[#allocation2] sm:$0xff]  ;;  %v423_v36 = vsel %vm268_vm4, 1.0, %v580_v3  ;;  %p516_p13 = pnand %p515_p12, %p636_p4  ;;  %p521_p3 = por %p520_p2, %p519_p1 }
  0x1d   : > { %v239_v22 = vld [vmem:[#allocation3] sm:$0xff]  ;;  %v289_v37 = vsel %vm214_vm0, %v423_v36, 0.0 }
  0x1e   : > { %v248_v17 = vld [vmem:[#allocation4] sm:$0xff]  ;;  %p517_p0 = pneg %p516_p13 }
  0x20   : > { %p522_p5 = pnand %p521_p3, %p517_p0 }
  0x8c   : > { %v227_v6 = vpop.xlane.xlu0 %226  ;;  %v251_v10 = vpop.permute.xlu1 %250 }
  0x8d   : > { %v228_v7 = vmax.f32 %v225_v5, %v227_v6  ;;  %vm252_vm1 = vcmp.eq.s32.totalorder %v222_v11, %v251_v10 }
  0x8e   : > { %v253_v12 = vsel %vm252_vm1, %v219_v1, 0.0 }
  0x8f   : > { %v240_v8 = vsub.f32 %v225_v5, %v228_v7  ;;  %247 = vst.msk [vmem:[#allocation2] sm:$0xff] %vm214_vm0, %v228_v7  ;;  %231 = vperm.xlu0 %490, %v228_v7   ;;  %254 = vadd.xlane.f32.xlu2 %v253_v12 }
  0x91   : > { %v241_v20 = vmul.f32 1.442695, %v240_v8 }
  0x96   : > { %v269_v30 = vld [vmem:[#allocation2] sm:$0xff] }
 0x101   : > { %v232_v13 = vpop.permute.xlu0 %231 }
 0x102   : > { %v234_v14 = vsub.f32 %v219_v1, %v232_v13  ;;  %v255_v18 = vpop.xlane.xlu2 %254 }
 0x103   : > { %v256_v19 = vadd.f32 %v255_v18, %v248_v17 }
 0x104   : > { %v235_v15 = vmul.f32 1.442695, %v234_v14 }
 0x105   : > { %257 = vst.msk [vmem:[#allocation4] sm:$0xff] %vm214_vm0, %v256_v19 }
 0x106   : > { %492 = vpow2.f32 %v235_v15 }
 0x107   : > { %494 = vpow2.f32 %v241_v20 }
 0x10c   : > { %v493_v16 = vpop.eup %492  ;;  %v274_v31 = vld [vmem:[#allocation4] sm:$0xff] }
 0x10d   : > { %237 = vadd.xlane.f32.xlu1 %v493_v16  ;;  %v495_v21 = vpop.eup %494 }
 0x10e   : > { %v243_v23 = vmul.f32 %v495_v21, %v239_v22 }
 0x180   : > { %v238_v24 = vpop.xlane.xlu1 %237 }
 0x181   : > { %v244_v25 = vadd.f32 %v243_v23, %v238_v24 }
 0x183   : > { %246 = vst.msk [vmem:[#allocation3] sm:$0xff] %vm214_vm0, %v244_v25 }
 0x18a   : > { %v270_v26 = vld [vmem:[#allocation3] sm:$0xff] }
 0x18b   : > { %496 = vlog2.f32 %v270_v26 }
 0x191   : > { %v497_v28 = vpop.eup %496 }
 0x192   : > { %v272_v29 = vmul.f32 0.6931472, %v497_v28 }
 0x194   : > { %v273_v32 = vadd.f32 %v272_v29, %v269_v30 }
 0x196   : > { %v275_v33 = vsub.f32 %v273_v32, %v274_v31 }
 0x198   : > { %v276_v34 = vsel %vm268_vm4, %v275_v33, 0.0 }
 0x199   : > { %v277_v35 = vsel %vm214_vm0, %v276_v34, 0.0 }
 0x19a   : > { %278 = vadd.xlane.f32.xlu2 %v277_v35 }
 0x1a2   : > { %290 = vadd.xlane.f32.xlu2 %v289_v37 }
 0x20d   : > { %v279_v38 = vpop.xlane.xlu2 %278 }
 0x20e   : > { %v280_v39 = vrot.slane %v279_v38, 4 }
 0x210   : > { %v281_v40 = vadd.f32 %v280_v39, %v279_v38 }
 0x212   : > { %v282_v41 = vrot.slane %v281_v40, 2 }
 0x214   : > { %v283_v42 = vadd.f32 %v282_v41, %v281_v40 }
 0x215   : > { %v291_v43 = vpop.xlane.xlu2 %290 }
 0x216   : > { %v292_v44 = vrot.slane %v291_v43, 4  ;;  %v284_v45 = vrot.slane %v283_v42, 1 }
 0x218   : > { %v293_v46 = vadd.f32 %v292_v44, %v291_v43  ;;  %v285_v47 = vadd.f32 %v284_v45, %v283_v42 }
 0x21a   : > { %v294_v48 = vrot.slane %v293_v46, 2  ;;  %428 = vpush %v285_v47 }
 0x21c   : > { %v295_v49 = vadd.f32 %v294_v48, %v293_v46 }
 0x21e   : > { %v296_v50 = vrot.slane %v295_v49, 1 }
 0x220   : > { %v297_v51 = vadd.f32 %v296_v50, %v295_v49 }
 0x222   : > { %430 = vpush %v297_v51 }
 0x24b   : > { %s429_s18 = spop %428 }
 0x24c   : > { %v303_v53 = vstv %s429_s18 }
 0x253   : > { %s431_s23 = spop %430 }
 0x254   : > { %v301_v52 = vstv %s431_s23 }
 0x255   : > { %v302_v54 = vsel %vm300_vm5, %v301_v52, 0.0 }
 0x256   : > { %v304_v55 = vsel %vm299_vm6, %v303_v53, %v302_v54 }
 0x257   : > { %305 = vst [vmem:[%s192_s15] sm:$0xff] %v304_v55 }
 0x258   : > { %525 = shalt.err (!%p522_p5)
}
 0x259   : > { %432 = dma.vmem_to_hbm [thread:$0]  (%p636_p4), %s321_s16, 128, %s323_s20, %s307_s12  }
 0x25a PF: > { %p438_p6 = scmp.ge.s32.totalorder %s576_s14, 2  ;;  %s334_s3 = sand.u32 1, %s556_s9  }
 0x25b   : > { %s335_s4 = scalar_lea.sflag [#allocation6], %s334_s3 }
 0x25c   : > { %p435_p7 = pnand %p438_p6, %p643_p8 }
 0x25e   : > { %p436_p9 = pneg %p435_p7 }
 0x260   : > { %551 = dma.done.wait (%p436_p9), %s335_s4, 128  }
 0x261   : > { %553 = vsyncadd (%p436_p9), %s335_s4, 4294967168  ;;  %s15_s14 = sadd.s32 1, %s576_s14   ;;  %s709_s9 = smov %s560_s10 }
 0x262   : > { %p12_p10 = scmp.ge.s32.totalorder %s15_s14, 4   ;;  %s710_s10 = smov %s564_s11 }
 0x263   : > { %s711_s11 = smov %s649_s22  ;;  %s712_s12 = smov %s572_s13 }
 0x264   : > { %s713_s13 = smov %s715_s17  ;;  %14 = sbr.rel (!%p12_p10) target bundleno = 4 (0x4), region = 74 }
 0x269   :  { %341 = vsyncpa [#allocation6], 1 }
 0x26a   :  { %343 = vsyncpa [#allocation6 + $0x1], 1 }

</bundles_post_ra>
